<compile_context>
chip_gen: v6e
topology: v6e:2x2x1
jax: 0.10.0
libtpu: 0.0.40
codegen_flags: <defaults>
</compile_context>

<pallas_src>
import functools

import numpy as np
import jax
import jax.numpy as jnp
from jax.experimental import pallas as pl
from jax.experimental.pallas import tpu as pltpu

_LANE = 128
_SUBLANE = 8
_SCRATCH_MARGIN = 4 << 20   # headroom for compiler-internal scratch


def _round_up(x, m):
    return ((x + m - 1) // m) * m


def _vmem_caps():
    """(tile_budget, limit_cap) in bytes, per generation."""
    try:
        cap = int(pltpu.get_tpu_info().vmem_capacity_bytes)
    except Exception:
        cap = 64 << 20          # assume the smallest VMEM (v7x: 64 MiB)
    tile_budget = int(cap * 0.72)   # ~46 MiB on v7x, ~92 MiB on v5e/v6e
    limit_cap = cap - (8 << 20)
    return tile_budget, limit_cap


def _pick_tile_rows(M, H, P, x_itemsize, out_itemsize, w_itemsize, tm_max):
    """Largest row tile whose double-buffered working set fits the budget."""
    tile_budget, _ = _vmem_caps()
    weight_bytes = 2 * (H * P * w_itemsize + P * 4)     # pinned, 2-buffered
    per_row = 2 * (H * x_itemsize + P * out_itemsize)   # x tile + out tile
    avail = tile_budget - weight_bytes - _SCRATCH_MARGIN
    tm_budget = max(_SUBLANE, (avail // per_row) // _SUBLANE * _SUBLANE)
    tm = min(tm_max, tm_budget, _round_up(M, _SUBLANE))
    return max(_SUBLANE, tm)


def fused_proj_kernel(x_ref, w_ref, b_ref, out_ref):
    """One fused lane-dense projection per row tile.

    x_ref:   [TM, H]  activations (current row tile, streams through VMEM)
    w_ref:   [H,  P]  (W_cls | W_cmp | zero-pad), VMEM-resident
    b_ref:   [1,  P]  f32 (b_cls | b_cmp | zero-pad), VMEM-resident
    out_ref: [TM, P]  (logits | embeds | pad) -- single unmasked lane-dense store
    """
    w = w_ref[...]
    acc = jnp.dot(x_ref[...].astype(w.dtype), w,
                  preferred_element_type=jnp.float32)
    out_ref[...] = (acc + b_ref[...]).astype(out_ref.dtype)


@functools.partial(jax.jit, static_argnames=("tm", "out_dtype"))
def run_fused_projection(x2d, w_fused, b_fused, *, tm, out_dtype):
    """x2d: [M, H]. No row padding: the last tile is ragged (masked by Pallas)."""
    M, H = x2d.shape
    P = w_fused.shape[1]
    grid = (pl.cdiv(M, tm),)

    x_b = np.dtype(x2d.dtype).itemsize
    w_b = np.dtype(w_fused.dtype).itemsize
    o_b = np.dtype(out_dtype).itemsize

    _, limit_cap = _vmem_caps()
    vmem_needed = (2 * tm * (H * x_b + P * o_b)         # double-buffered tiles
                   + 2 * (H * P * w_b + P * 4)          # pinned weight/bias
                   + _SCRATCH_MARGIN)
    vmem_limit = int(max(16 << 20, min(vmem_needed, limit_cap)))

    cost = pl.CostEstimate(
        flops=2 * M * H * P,
        transcendentals=0,
        bytes_accessed=M * H * x_b + M * P * o_b + H * P * w_b + P * 4,
    )

    grid_spec = pltpu.PrefetchScalarGridSpec(
        num_scalar_prefetch=0,
        grid=grid,
        in_specs=[
            # Row tile of activations: streams through VMEM, double-buffered.
            pl.BlockSpec((tm, H), lambda i: (i, 0)),
            # Fused weight / bias: pinned to block (0,0) -> stay VMEM-resident.
            pl.BlockSpec((H, P), lambda i: (0, 0)),
            pl.BlockSpec((1, P), lambda i: (0, 0)),
        ],
        out_specs=pl.BlockSpec((tm, P), lambda i: (i, 0)),
    )

    return pl.pallas_call(
        fused_proj_kernel,
        grid_spec=grid_spec,
        out_shape=jax.ShapeDtypeStruct((M, P), out_dtype),
        compiler_params=pltpu.CompilerParams(
            # Independent row tiles -> megacore sharding on v7x.
            dimension_semantics=("parallel",),
            vmem_limit_bytes=vmem_limit,
        ),
        cost_estimate=cost,
    )(x2d, w_fused, b_fused)


def prepare_fused_weights(weights, compute_dtype=jnp.float32):
    """One-time weight preprocessing (hoisted out of the hot path).

    weights: dict with w_cls [H, T], b_cls [T], w_cmp [H, C], b_cmp [C].
    compute_dtype: MXU operand dtype (use jnp.bfloat16 on v5e to cut the
    f32 multi-pass matmul cost; default f32 keeps exact reference numerics).
    """
    T = weights["w_cls"].shape[1]
    C = weights["w_cmp"].shape[1]
    P = _round_up(T + C, _LANE)
    w_fused = jnp.concatenate([weights["w_cls"], weights["w_cmp"]], axis=1)
    b_fused = jnp.concatenate([weights["b_cls"], weights["b_cmp"]], axis=0)
    pad_cols = P - (T + C)
    if pad_cols:
        w_fused = jnp.pad(w_fused, ((0, 0), (0, pad_cols)))
        b_fused = jnp.pad(b_fused, ((0, pad_cols),))
    return {
        "w_fused": jnp.asarray(w_fused, compute_dtype),
        "b_fused": jnp.asarray(b_fused, jnp.float32)[None, :],  # bias add in f32
        "num_tags": T,
        "cand_emb_dim": C,
    }


def long_encoder_forward(raw_ctxt_encoding, fused_weights,
                         is_biencoder=False, use_golden_tags=False,
                         golden_tags=None, b_tag=1, tm_max=4096,
                         out_dtype=jnp.float32):
    """Mirrors LongEncoderModule.forward, given the encoder output.

    raw_ctxt_encoding: [B, S, H] (f32 or bf16 -- bf16 halves the dominant
    HBM stream). fused_weights: output of prepare_fused_weights().
    """
    # TODO(synk): the pretrained Longformer/BERT context encoder
    # (get_raw_ctxt_encoding) is a full transformer checkpoint with no clean
    # single-kernel Pallas equivalent; its output is taken as an input here.
    B, S, H = raw_ctxt_encoding.shape
    T = fused_weights["num_tags"]
    C = fused_weights["cand_emb_dim"]
    w_fused = fused_weights["w_fused"]
    b_fused = fused_weights["b_fused"]
    P = w_fused.shape[1]

    M = B * S
    x2d = raw_ctxt_encoding.reshape(M, H)   # row-major reshape, no HBM copy

    tm = _pick_tile_rows(
        M, H, P,
        np.dtype(x2d.dtype).itemsize,
        np.dtype(out_dtype).itemsize,
        np.dtype(w_fused.dtype).itemsize,
        tm_max,
    )

    fused_out = run_fused_projection(x2d, w_fused, b_fused,
                                     tm=tm, out_dtype=out_dtype)

    # Slice the lane-dense output: cols [0:T) are logits, [T:T+C) are embeds.
    # Padded columns never reach argmax because of this slice.
    logits2d = fused_out[:, :T]
    emb2d = fused_out[:, T:T + C]

    ctxt_logits = logits2d.reshape(B, S, T)
    ctxt_tags = jnp.argmax(ctxt_logits, axis=2)          # cheap VPU work in XLA
    compressed = emb2d.reshape(B, S, C)

    ctxt_outs = {"ctxt_logits": ctxt_logits, "ctxt_tags": ctxt_tags}

    if is_biencoder:
        # get_ctxt_embeds: compression was already applied to every position
        # inside the kernel (mathematically identical to compressing after the
        # gather, since the compression is per-row linear).
        if use_golden_tags:
            assert golden_tags is not None
            mask = golden_tags == b_tag
        else:
            mask = ctxt_tags == b_tag
            if golden_tags is not None:
                # Device-side fallback selection (no blocking host sync here).
                mask = jnp.where(jnp.any(mask), mask, golden_tags == b_tag)
        # TODO(synk): ragged boolean gather has a data-dependent output shape;
        # it stays in plain JAX outside the kernel (and outside any jit).
        ctxt_outs["ctxt_embeds"] = compressed[mask]

    return ctxt_outs


if __name__ == "__main__":
    # Small synthetic shapes consistent with the module:
    #   longformer_output_dim (H) = 32, num_tags (conll) = 9, cand_emb_dim = 16
    B, S, H = 2, 8, 32
    NUM_TAGS = 9       # params['conll'] == True
    CAND_EMB_DIM = 16  # != H -> linear_compression is created

    key = jax.random.PRNGKey(0)
    k_x, k_wc, k_bc, k_wm, k_bm, k_g = jax.random.split(key, 6)

    raw_ctxt_encoding = jax.random.normal(k_x, (B, S, H), dtype=jnp.float32)

    # Deterministic parameter init (PyTorch-Linear-like uniform(-1/sqrt(H), 1/sqrt(H))).
    bound = 1.0 / (H ** 0.5)
    weights = {
        "w_cls": jax.random.uniform(k_wc, (H, NUM_TAGS), jnp.float32, -bound, bound),
        "b_cls": jax.random.uniform(k_bc, (NUM_TAGS,), jnp.float32, -bound, bound),
        "w_cmp": jax.random.uniform(k_wm, (H, CAND_EMB_DIM), jnp.float32, -bound, bound),
        "b_cmp": jax.random.uniform(k_bm, (CAND_EMB_DIM,), jnp.float32, -bound, bound),
    }

    golden_tags = jax.random.randint(k_g, (B, S), 0, NUM_TAGS, dtype=jnp.int32)

    # One-time weight fusion (hoisted out of the forward hot path).
    fused_weights = prepare_fused_weights(weights, compute_dtype=jnp.float32)

    outs = long_encoder_forward(
        raw_ctxt_encoding, fused_weights,
        is_biencoder=True, use_golden_tags=False,
        golden_tags=golden_tags, b_tag=1,
    )

    jax.block_until_ready(outs["ctxt_logits"])
    jax.block_until_ready(outs["ctxt_tags"])
    if "ctxt_embeds" in outs:
        jax.block_until_ready(outs["ctxt_embeds"])

    # Cross-check against a pure-JAX reference of the same math.
    ref_logits = raw_ctxt_encoding @ weights["w_cls"] + weights["b_cls"]
    ref_tags = jnp.argmax(ref_logits, axis=2)
    assert jnp.allclose(outs["ctxt_logits"], ref_logits, atol=1e-5)
    assert bool(jnp.all(outs["ctxt_tags"] == ref_tags))

    # Reference biencoder embeds: gather raw rows, then compress (as in PyTorch).
    mask = ref_tags == 1
    if not bool(jnp.any(mask)):
        mask = golden_tags == 1
    ref_embeds = raw_ctxt_encoding[mask] @ weights["w_cmp"] + weights["b_cmp"]
    assert outs["ctxt_embeds"].shape == ref_embeds.shape
    assert jnp.allclose(outs["ctxt_embeds"], ref_embeds, atol=1e-5)

    print("KERNEL_OK")
</pallas_src>

<mosaic_0001>
module attributes {stable_mosaic.version = 11 : i64} {
  func.func @fused_proj_kernel(%arg0: i32, %arg1: memref<16x32xf32, #tpu.memory_space<vmem>>, %arg2: memref<32x128xf32, #tpu.memory_space<vmem>>, %arg3: memref<1x128xf32, #tpu.memory_space<vmem>>, %arg4: memref<16x128xf32, #tpu.memory_space<vmem>>) attributes {dimension_semantics = [#tpu.dimension_semantics<parallel>], iteration_bounds = array<i64: 1>, scalar_prefetch = 0 : i64, scratch_operands = 0 : i64, tpu.core_type = #tpu.core_type<tc>, window_params = [{transform_indices = @transform_0, window_bounds = array<i64: 16, 32>}, {pipeline_mode = #tpu.pipeline_mode<synchronous>, transform_indices = @transform_1, window_bounds = array<i64: 32, 128>}, {pipeline_mode = #tpu.pipeline_mode<synchronous>, transform_indices = @transform_2, window_bounds = array<i64: 1, 128>}, {transform_indices = @transform_3, window_bounds = array<i64: 16, 128>}]} {
    %c0 = arith.constant 0 : index
    %c0_0 = arith.constant 0 : index
    %0 = vector.load %arg2[%c0, %c0_0] : memref<32x128xf32, #tpu.memory_space<vmem>>, vector<32x128xf32>
    %c0_1 = arith.constant 0 : index
    %c0_2 = arith.constant 0 : index
    %1 = vector.load %arg1[%c0_1, %c0_2] : memref<16x32xf32, #tpu.memory_space<vmem>>, vector<16x32xf32>
    %cst = arith.constant dense<0.000000e+00> : vector<16x128xf32>
    %2 = tpu.matmul %1, %0, %cst {dimension_numbers = #tpu.dot_dimension_numbers<[1], [0], [0], [1], [0, 0, 1, 1], [], []>} : vector<16x32xf32>, vector<32x128xf32>, vector<16x128xf32> -> vector<16x128xf32>
    %c0_3 = arith.constant 0 : index
    %c0_4 = arith.constant 0 : index
    %3 = vector.load %arg3[%c0_3, %c0_4] : memref<1x128xf32, #tpu.memory_space<vmem>>, vector<1x128xf32>
    %4 = vector.broadcast %3 : vector<1x128xf32> to vector<16x128xf32>
    %5 = arith.addf %2, %4 : vector<16x128xf32>
    %c0_5 = arith.constant 0 : index
    %c0_6 = arith.constant 0 : index
    %6 = vector.load %arg4[%c0_5, %c0_6] : memref<16x128xf32, #tpu.memory_space<vmem>>, vector<16x128xf32>
    tpu.vector_store %arg4[%c0_5, %c0_6], %5 {strides = array<i32>} : memref<16x128xf32, #tpu.memory_space<vmem>>, vector<16x128xf32>,
    return
  }
  func.func @transform_0(%arg0: i32) -> (i32, i32) {
    %c0_i32 = arith.constant 0 : i32
    %c0_i32_0 = arith.constant 0 : i32
    return %arg0, %c0_i32 : i32, i32
  }
  func.func @transform_1(%arg0: i32) -> (i32, i32) {
    %c0_i32 = arith.constant 0 : i32
    %c0_i32_0 = arith.constant 0 : i32
    %c0_i32_1 = arith.constant 0 : i32
    return %c0_i32, %c0_i32_0 : i32, i32
  }
  func.func @transform_2(%arg0: i32) -> (i32, i32) {
    %c0_i32 = arith.constant 0 : i32
    %c0_i32_0 = arith.constant 0 : i32
    %c0_i32_1 = arith.constant 0 : i32
    return %c0_i32, %c0_i32_0 : i32, i32
  }
  func.func @transform_3(%arg0: i32) -> (i32, i32) {
    %c0_i32 = arith.constant 0 : i32
    %c0_i32_0 = arith.constant 0 : i32
    return %arg0, %c0_i32 : i32, i32
  }
}

</mosaic_0001>

<bundles_post_ra>
// kernel: run_fused_projection.1
= control target key start
LH: loop header
LB: loop body
LE: loop exit
PB: predicated region body
PF: predicated region fallthrough
CT: control target
= control target key end

     0   :  { %8 = vsyncpa [#allocation3], 0  ;;  %s297_s0 = inlined_call_operand.hbm [shape: f32[16,32], index: 0, kind: input, shape index: {}]   ;;  %s298_s1 = inlined_call_operand.hbm [shape: f32[32,128], index: 1, kind: input, shape index: {}]   ;;  %s299_s2 = inlined_call_operand.vmem [shape: f32[1,128], index: 2, kind: input, shape index: {}]   ;;  %s300_s3 = inlined_call_operand.hbm [shape: f32[16,128], index: 3, kind: output, shape index: {}]  }
   0x1   :  { %9 = vsyncpa [#allocation6], 0 }
   0x2   :  { %10 = vsyncpa [#allocation4], 0  ;;  %s249_s12 = smov [#allocation2]  }
   0x3   :  { %s16_s13 = sshll.u32 %s249_s12, 4  ;;  %s17_s13 = int_to_ptr.vmem [resolvable:$true] %s16_s13 }
   0x4   :  { %s191_s14 = scalar_lea.vmem %s17_s13, 256  ;;  %p196_p1 = scmp.lt.s32.totalorder %s17_s13, %s17_s13 }
   0x5   :  { %p192_p0 = scmp.ne.s32.totalorder %s17_s13, %s191_s14  ;;  %p197_p2 = scmp.lt.s32.totalorder %s191_s14, %s191_s14 }
   0x7   :  { %p198_p3 = por %p197_p2, %p196_p1 }
   0x9   :  { %p199_p4 = pnand %p198_p3, %p192_p0 }
   0xb   :  { %202 = shalt.err (!%p199_p4)
}
   0xc   :  { %s250_s15 = smov 128   ;;  %s251_s16 = smov 8  }
   0xd   :  { %22 = dma.hbm_to_vmem [thread:$0]  %s297_s0, 256, %s17_s13, [#allocation3], %s250_s15, %s250_s15, %s251_s16  }
   0xe   :  { %s252_s19 = smov [#allocation5]  }
   0xf   :  { %s28_s20 = sshll.u32 %s252_s19, 4  ;;  %s29_s20 = int_to_ptr.vmem [resolvable:$true] %s28_s20 }
  0x10   :  { %s211_s21 = scalar_lea.vmem %s29_s20, 512  ;;  %p216_p6 = scmp.lt.s32.totalorder %s29_s20, %s29_s20 }
  0x11   :  { %p212_p5 = scmp.ne.s32.totalorder %s29_s20, %s211_s21  ;;  %p217_p7 = scmp.lt.s32.totalorder %s211_s21, %s211_s21 }
  0x13   :  { %p218_p8 = por %p217_p7, %p216_p6 }
  0x15   :  { %p219_p9 = pnand %p218_p8, %p212_p5 }
  0x17   :  { %222 = shalt.err (!%p219_p9)
}
  0x18   :  { %34 = dma.hbm_to_vmem [thread:$0]  %s298_s1, 512, %s29_s20, [#allocation6], %s250_s15, %s250_s15, %s251_s16  }
  0x19   :  { %243 = dma.done.wait [#allocation3], 256  }
  0x1a   :  { %244 = vsyncadd [#allocation3], 4294967040 }
  0x1b   :  { %245 = dma.done.wait [#allocation6], 512  }
  0x1c   :  { %246 = vsyncadd [#allocation6], 4294966784  ;;  %vm56_vm0 = vcmask 261120   ;;  %v46_v0 = vld [vmem:[#allocation5 + $0x18] sm:$0xff]  ;;  %v45_v1 = vld [vmem:[#allocation5 + $0x10] sm:$0xff]  ;;  %s253_s24 = smov [#allocation7]  }
  0x1d   :  { %167 = vmatprep.subr.mxu0 %v46_v0  ;;  %v47_v2 = vld [vmem:[#allocation2] sm:$0xff]  ;;  %v44_v3 = vld [vmem:[#allocation5 + $0x8] sm:$0xff]  ;;  %v43_v4 = vld [vmem:[#allocation5] sm:$0xff]  ;;  %s145_s25 = sshll.u32 %s253_s24, 4  ;;  %s146_s25 = int_to_ptr.vmem [resolvable:$true] %s145_s25 }
  0x1e   :  { %168 = vmatpush3.msra.mxu0 %v46_v0  ;;  %175 = vmatprep.mubr.msk.f32.mxu0 %vm56_vm0, %v47_v2  ;;  %v48_v5 = vld [vmem:[#allocation2 + $0x8] sm:$0xff]  ;;  %v158_v6 = vld [vmem:[%s299_s2] ss:$0 sm:$0xff]  ;;  %s223_s26 = scalar_lea.vmem %s146_s25, 256  ;;  %p228_p11 = scmp.lt.s32.totalorder %s146_s25, %s146_s25 }
  0x1f   :  { %169 = vmatprep.subr.mxu0 %v45_v1  ;;  %p224_p10 = scmp.ne.s32.totalorder %s146_s25, %s223_s26  ;;  %p229_p12 = scmp.lt.s32.totalorder %s223_s26, %s223_s26 }
  0x20   :  { %170 = vmatpush3.msra.mxu0 %v45_v1 }
  0x21   :  { %171 = vmatprep.subr.mxu0 %v44_v3  ;;  %p230_p13 = por %p229_p12, %p228_p11 }
  0x22   :  { %172 = vmatpush3.msra.mxu0 %v44_v3 }
  0x23   :  { %173 = vmatprep.subr.mxu0 %v43_v4  ;;  %p231_p0 = pnand %p230_p13, %p224_p10 }
  0x24   :  { %174 = vmatpush3.msra.mxu0 %v43_v4 }
  0x25   :  { %176 = vmatmul.mubr.msk.f32.vlgmr.msra.gmra.mxu0 %vm56_vm0, %v48_v5 }
  0xe5   :  { %v177_v7 = vpop.f32.mrf.mxu0 }
  0xe6   :  { %v135_v8 = vadd.f32 %v177_v7, %v158_v6 }
  0xe7   :  { %v129_v9 = vpop.f32.mrf.mxu0 }
  0xe8   :  { %139 = vst [vmem:[#allocation7 + $0x8] sm:$0xff] %v135_v8  ;;  %v130_v10 = vadd.f32 %v158_v6, %v129_v9 }
  0xea   :  { %138 = vst [vmem:[#allocation7] sm:$0xff] %v130_v10 }
  0xeb   :  { %234 = shalt.err (!%p231_p0)
}
  0xec   :  { %151 = dma.vmem_to_hbm [thread:$0]  %s146_s25, 256, %s300_s3, [#allocation4], %s250_s15, %s250_s15, %s251_s16  }
  0xed   :  { %247 = dma.done.wait [#allocation4], 256  }
  0xee   :  { %248 = vsyncadd [#allocation4], 4294967040 }
  0xef   :  { %155 = vsyncpa [#allocation3], 1 }
  0xf0   :  { %156 = vsyncpa [#allocation6], 1 }
  0xf1   :  { %157 = vsyncpa [#allocation4], 1 }

</bundles_post_ra>
